<compile_context>
chip_gen: v7x
topology: tpu7x:2x2x1
jax: 0.10.0
libtpu: 0.0.40
codegen_flags: <defaults>
</compile_context>

<pallas_src>
import jax
import jax.numpy as jnp
from jax.experimental import pallas as pl
from jax.experimental.pallas import tpu as pltpu


def _round_up(x, m):
    return (x + m - 1) // m * m


def time_embedding_kernel(x_ref, w1_ref, b1_ref, w2_ref, b2_ref, o_ref):
    # ---- linear_1: (B, K) @ (K, H) + (1, H), f32 accumulate ----
    # Recomputed per N tile: B*K*H flops is negligible vs the w2 stream.
    xb = x_ref[...].astype(jnp.bfloat16)
    h = jnp.dot(xb, w1_ref[...], preferred_element_type=jnp.float32)
    h = h + b1_ref[...]
    # ---- SiLU in f32: h * sigmoid(h) ----
    h = h * jax.nn.sigmoid(h)
    # ---- linear_2 column slab: (B, H) @ (H, TN) + (1, TN) ----
    hb = h.astype(jnp.bfloat16)
    y = jnp.dot(hb, w2_ref[...], preferred_element_type=jnp.float32)
    y = y + b2_ref[...]
    o_ref[...] = y.astype(o_ref.dtype)


def time_embedding(x, w1, b1, w2, b2, *, tn=None):
    B, n_embd = x.shape
    hidden = w1.shape[1]  # 4 * n_embd
    assert w1.shape == (n_embd, hidden)
    assert w2.shape == (hidden, hidden)

    # Zero-pad the contraction dim to a multiple of 128 (exact: zeros add nothing).
    k_pad = _round_up(n_embd, 128)
    if k_pad != n_embd:
        x = jnp.pad(x, ((0, 0), (0, k_pad - n_embd)))
        w1 = jnp.pad(w1, ((0, k_pad - n_embd), (0, 0)))

    # bf16 weights: halves HBM traffic on a bandwidth-bound kernel.
    w1 = w1.astype(jnp.bfloat16)
    w2 = w2.astype(jnp.bfloat16)
    b1_2d = b1.reshape(1, hidden).astype(jnp.float32)
    b2_2d = b2.reshape(1, hidden).astype(jnp.float32)

    # Tile size over linear_2 output columns (lane-aligned).
    if tn is None:
        tn = hidden
        if hidden % 128 == 0:
            for cand in (512, 256, 128):
                if hidden % cand == 0:
                    tn = cand
                    break
    assert hidden % tn == 0
    grid = (hidden // tn,)

    out_dtype = x.dtype
    flops = 2 * B * (k_pad * hidden + hidden * hidden)
    bytes_accessed = (
        x.size * x.dtype.itemsize        # activations in
        + w1.size * 2 + w2.size * 2      # bf16 weights
        + b1_2d.size * 4 + b2_2d.size * 4
        + B * hidden * jnp.dtype(out_dtype).itemsize  # output
    )
    cost = pl.CostEstimate(
        flops=flops, transcendentals=B * hidden, bytes_accessed=bytes_accessed
    )

    return pl.pallas_call(
        time_embedding_kernel,
        out_shape=jax.ShapeDtypeStruct((B, hidden), out_dtype),
        grid=grid,
        in_specs=[
            pl.BlockSpec((B, k_pad), lambda j: (0, 0)),       # x: resident
            pl.BlockSpec((k_pad, hidden), lambda j: (0, 0)),  # w1: resident
            pl.BlockSpec((1, hidden), lambda j: (0, 0)),      # b1: resident
            pl.BlockSpec((hidden, tn), lambda j: (0, j)),     # w2: streamed by N tile
            pl.BlockSpec((1, tn), lambda j: (0, j)),          # b2: streamed by N tile
        ],
        out_specs=pl.BlockSpec((B, tn), lambda j: (0, j)),
        compiler_params=pltpu.CompilerParams(
            dimension_semantics=("parallel",),     # independent N tiles -> megacore on v7x
            vmem_limit_bytes=32 * 1024 * 1024,     # explicit budget, safe on v7x's 64 MiB
        ),
        cost_estimate=cost,
    )(x, w1, b1_2d, w2, b2_2d)


def time_embedding_ref_f32(x, w1, b1, w2, b2):
    h = x @ w1 + b1
    h = h * jax.nn.sigmoid(h)
    return h @ w2 + b2


def time_embedding_ref_bf16(x, w1, b1, w2, b2):
    # Mirrors the kernel's numerics: bf16 matmul inputs, f32 accumulation,
    # SiLU in f32, f32 bias add.
    h = jnp.dot(
        x.astype(jnp.bfloat16), w1.astype(jnp.bfloat16),
        preferred_element_type=jnp.float32,
    ) + b1.astype(jnp.float32)
    h = h * jax.nn.sigmoid(h)
    y = jnp.dot(
        h.astype(jnp.bfloat16), w2.astype(jnp.bfloat16),
        preferred_element_type=jnp.float32,
    ) + b2.astype(jnp.float32)
    return y


if __name__ == "__main__":
    # Small shapes consistent with the module: n_embd=32 -> hidden=128, batch=2.
    B, n_embd = 2, 32
    hidden = 4 * n_embd

    key = jax.random.PRNGKey(0)
    kx, kw1, kb1, kw2, kb2 = jax.random.split(key, 5)

    x = jax.random.normal(kx, (B, n_embd), dtype=jnp.float32)
    # nn.Linear default-ish init (uniform scaled by 1/sqrt(fan_in)), stored as (in, out).
    w1 = jax.random.uniform(kw1, (n_embd, hidden), minval=-1.0, maxval=1.0) / jnp.sqrt(n_embd)
    b1 = jax.random.uniform(kb1, (hidden,), minval=-1.0, maxval=1.0) / jnp.sqrt(n_embd)
    w2 = jax.random.uniform(kw2, (hidden, hidden), minval=-1.0, maxval=1.0) / jnp.sqrt(hidden)
    b2 = jax.random.uniform(kb2, (hidden,), minval=-1.0, maxval=1.0) / jnp.sqrt(hidden)
    w1 = w1.astype(jnp.float32); b1 = b1.astype(jnp.float32)
    w2 = w2.astype(jnp.float32); b2 = b2.astype(jnp.float32)

    out = time_embedding(x, w1, b1, w2, b2)
    jax.block_until_ready(out)
    assert out.shape == (B, hidden)

    # Tight check vs a reference with the same bf16-weight numerics.
    ref_bf16 = time_embedding_ref_bf16(x, w1, b1, w2, b2)
    assert jnp.allclose(out, ref_bf16, atol=1e-3, rtol=1e-3), "mismatch vs bf16 reference"

    # Loose sanity check vs pure-f32 reference (bf16 weight quantization noise).
    ref_f32 = time_embedding_ref_f32(x, w1, b1, w2, b2)
    assert jnp.allclose(out, ref_f32, atol=5e-2, rtol=5e-2), "mismatch vs f32 reference"

    print("KERNEL_OK")
</pallas_src>

<mosaic_0001>
module attributes {stable_mosaic.version = 11 : i64} {
  func.func @time_embedding_kernel(%arg0: i32, %arg1: memref<2x128xf32, #tpu.memory_space<vmem>>, %arg2: memref<128x128xbf16, #tpu.memory_space<vmem>>, %arg3: memref<1x128xf32, #tpu.memory_space<vmem>>, %arg4: memref<128x128xbf16, #tpu.memory_space<vmem>>, %arg5: memref<1x128xf32, #tpu.memory_space<vmem>>, %arg6: memref<2x128xf32, #tpu.memory_space<vmem>>) attributes {dimension_semantics = [#tpu.dimension_semantics<parallel>], iteration_bounds = array<i64: 1>, scalar_prefetch = 0 : i64, scratch_operands = 0 : i64, tpu.core_type = #tpu.core_type<tc>, window_params = [{pipeline_mode = #tpu.pipeline_mode<synchronous>, transform_indices = @transform_0, window_bounds = array<i64: 2, 128>}, {pipeline_mode = #tpu.pipeline_mode<synchronous>, transform_indices = @transform_1, window_bounds = array<i64: 128, 128>}, {pipeline_mode = #tpu.pipeline_mode<synchronous>, transform_indices = @transform_2, window_bounds = array<i64: 1, 128>}, {transform_indices = @transform_3, window_bounds = array<i64: 128, 128>}, {transform_indices = @transform_4, window_bounds = array<i64: 1, 128>}, {transform_indices = @transform_5, window_bounds = array<i64: 2, 128>}]} {
    %c0 = arith.constant 0 : index
    %c0_0 = arith.constant 0 : index
    %0 = vector.load %arg1[%c0, %c0_0] : memref<2x128xf32, #tpu.memory_space<vmem>>, vector<2x128xf32>
    %1 = arith.truncf %0 : vector<2x128xf32> to vector<2x128xbf16>
    %c0_1 = arith.constant 0 : index
    %c0_2 = arith.constant 0 : index
    %2 = vector.load %arg2[%c0_1, %c0_2] : memref<128x128xbf16, #tpu.memory_space<vmem>>, vector<128x128xbf16>
    %cst = arith.constant dense<0.000000e+00> : vector<2x128xf32>
    %3 = tpu.matmul %1, %2, %cst {dimension_numbers = #tpu.dot_dimension_numbers<[1], [0], [0], [1], [0, 0, 1, 1], [], []>} : vector<2x128xbf16>, vector<128x128xbf16>, vector<2x128xf32> -> vector<2x128xf32>
    %c0_3 = arith.constant 0 : index
    %c0_4 = arith.constant 0 : index
    %4 = vector.load %arg3[%c0_3, %c0_4] : memref<1x128xf32, #tpu.memory_space<vmem>>, vector<1x128xf32>
    %5 = vector.broadcast %4 : vector<1x128xf32> to vector<2x128xf32>
    %6 = arith.addf %3, %5 : vector<2x128xf32>
    %7 = arith.negf %6 : vector<2x128xf32>
    %8 = math.exp %7 : vector<2x128xf32>
    %cst_5 = arith.constant 1.000000e+00 : f32
    %9 = vector.broadcast %cst_5 : f32 to vector<2x128xf32>
    %10 = arith.addf %9, %8 : vector<2x128xf32>
    %11 = arith.divf %9, %10 : vector<2x128xf32>
    %12 = arith.mulf %6, %11 : vector<2x128xf32>
    %13 = arith.truncf %12 : vector<2x128xf32> to vector<2x128xbf16>
    %c0_6 = arith.constant 0 : index
    %c0_7 = arith.constant 0 : index
    %14 = vector.load %arg4[%c0_6, %c0_7] : memref<128x128xbf16, #tpu.memory_space<vmem>>, vector<128x128xbf16>
    %cst_8 = arith.constant dense<0.000000e+00> : vector<2x128xf32>
    %15 = tpu.matmul %13, %14, %cst_8 {dimension_numbers = #tpu.dot_dimension_numbers<[1], [0], [0], [1], [0, 0, 1, 1], [], []>} : vector<2x128xbf16>, vector<128x128xbf16>, vector<2x128xf32> -> vector<2x128xf32>
    %c0_9 = arith.constant 0 : index
    %c0_10 = arith.constant 0 : index
    %16 = vector.load %arg5[%c0_9, %c0_10] : memref<1x128xf32, #tpu.memory_space<vmem>>, vector<1x128xf32>
    %17 = vector.broadcast %16 : vector<1x128xf32> to vector<2x128xf32>
    %18 = arith.addf %15, %17 : vector<2x128xf32>
    %c0_11 = arith.constant 0 : index
    %c0_12 = arith.constant 0 : index
    %19 = vector.load %arg6[%c0_11, %c0_12] : memref<2x128xf32, #tpu.memory_space<vmem>>, vector<2x128xf32>
    tpu.vector_store %arg6[%c0_11, %c0_12], %18 {strides = array<i32>} : memref<2x128xf32, #tpu.memory_space<vmem>>, vector<2x128xf32>,
    return
  }
  func.func @transform_0(%arg0: i32) -> (i32, i32) {
    %c0_i32 = arith.constant 0 : i32
    %c0_i32_0 = arith.constant 0 : i32
    %c0_i32_1 = arith.constant 0 : i32
    return %c0_i32, %c0_i32_0 : i32, i32
  }
  func.func @transform_1(%arg0: i32) -> (i32, i32) {
    %c0_i32 = arith.constant 0 : i32
    %c0_i32_0 = arith.constant 0 : i32
    %c0_i32_1 = arith.constant 0 : i32
    return %c0_i32, %c0_i32_0 : i32, i32
  }
  func.func @transform_2(%arg0: i32) -> (i32, i32) {
    %c0_i32 = arith.constant 0 : i32
    %c0_i32_0 = arith.constant 0 : i32
    %c0_i32_1 = arith.constant 0 : i32
    return %c0_i32, %c0_i32_0 : i32, i32
  }
  func.func @transform_3(%arg0: i32) -> (i32, i32) {
    %c0_i32 = arith.constant 0 : i32
    %c0_i32_0 = arith.constant 0 : i32
    return %c0_i32, %arg0 : i32, i32
  }
  func.func @transform_4(%arg0: i32) -> (i32, i32) {
    %c0_i32 = arith.constant 0 : i32
    %c0_i32_0 = arith.constant 0 : i32
    return %c0_i32, %arg0 : i32, i32
  }
  func.func @transform_5(%arg0: i32) -> (i32, i32) {
    %c0_i32 = arith.constant 0 : i32
    %c0_i32_0 = arith.constant 0 : i32
    return %c0_i32, %arg0 : i32, i32
  }
}

</mosaic_0001>

<bundles_post_ra>
// kernel: tpu_custom_call.1
= control target key start
LH: loop header
LB: loop body
LE: loop exit
PB: predicated region body
PF: predicated region fallthrough
CT: control target
= control target key end

     0   :  { %10 = vsyncpa [#allocation3], 0  ;;  %s607_s0 = inlined_call_operand.hbm [shape: f32[2,128], index: 0, kind: input, shape index: {}]   ;;  %s608_s1 = inlined_call_operand.hbm [shape: bf16[128,128], index: 1, kind: input, shape index: {}]   ;;  %s609_s2 = inlined_call_operand.vmem [shape: f32[1,128], index: 2, kind: input, shape index: {}]   ;;  %s610_s3 = inlined_call_operand.hbm [shape: bf16[128,128], index: 3, kind: input, shape index: {}]   ;;  %s611_s4 = inlined_call_operand.vmem [shape: f32[1,128], index: 4, kind: input, shape index: {}]   ;;  %s612_s5 = inlined_call_operand.hbm [shape: f32[2,128], index: 5, kind: output, shape index: {}]  }
   0x1   :  { %11 = vsyncpa [#allocation6], 0 }
   0x2   :  { %12 = vsyncpa [#allocation4], 0  ;;  %s509_s18 = smov [#allocation5]   ;;  %s415_s22 = scalar_lea.hbm %s608_s1, 1024 }
   0x3   :  { %s28_s19 = sshll.u32 %s509_s18, 4  ;;  %p416_p0 = scmp.ne.s32.totalorder %s608_s1, %s415_s22  ;;  %s29_s19 = int_to_ptr.vmem [resolvable:$true] %s28_s19 }
   0x4   :  { %p419_p1 = scmp.lt.u32.totalorder %s415_s22, %s608_s1 }
   0x6   :  { %p421_p2 = pnand %p419_p1, %p416_p0 }
   0x8   :  { %424 = shalt.err (!%p421_p2)
}
   0x9   :  { %s425_s27 = scalar_lea.vmem %s29_s19, 1024  ;;  %p430_p4 = scmp.lt.s32.totalorder %s29_s19, %s29_s19 }
   0xa   :  { %p426_p3 = scmp.ne.s32.totalorder %s29_s19, %s425_s27  ;;  %p431_p5 = scmp.lt.s32.totalorder %s425_s27, %s425_s27 }
   0xc   :  { %p432_p6 = por %p431_p5, %p430_p4 }
   0xe   :  { %p433_p7 = pnand %p432_p6, %p426_p3 }
  0x10   :  { %436 = shalt.err (!%p433_p7)
}
  0x11   :  { %s510_s28 = smov 64   ;;  %s511_s29 = smov 4  }
  0x12   :  { %34 = dma.hbm_to_vmem [thread:$0]  %s608_s1, 1024, %s29_s19, [#allocation6], %s510_s28, %s510_s28, %s511_s29  }
  0x13   :  { %s512_s7 = smov [#allocation2]   ;;  %s513_s9 = smov [#allocation7]  }
  0x14   :  { %s19_s8 = sshll.u32 %s512_s7, 4  ;;  %s42_s10 = sshll.u32 %s513_s9, 4  ;;  %s20_s8 = int_to_ptr.vmem [resolvable:$true] %s19_s8  ;;  %s43_s10 = int_to_ptr.vmem [resolvable:$true] %s42_s10 }
  0x15   :  { %s437_s13 = scalar_lea.hbm %s607_s0, 32 }
  0x16   :  { %p438_p8 = scmp.ne.s32.totalorder %s607_s0, %s437_s13  ;;  %p441_p9 = scmp.lt.u32.totalorder %s437_s13, %s607_s0 }
  0x18   :  { %p443_p10 = pnand %p441_p9, %p438_p8 }
  0x1a   :  { %446 = shalt.err (!%p443_p10)
}
  0x1b   :  { %s447_s1 = scalar_lea.vmem %s20_s8, 32  ;;  %p452_p12 = scmp.lt.s32.totalorder %s20_s8, %s20_s8 }
  0x1c   :  { %p448_p11 = scmp.ne.s32.totalorder %s20_s8, %s447_s1  ;;  %p453_p13 = scmp.lt.s32.totalorder %s447_s1, %s447_s1 }
  0x1e   :  { %p454_p0 = por %p453_p13, %p452_p12 }
  0x20   :  { %p455_p1 = pnand %p454_p0, %p448_p11 }
  0x22   :  { %458 = shalt.err (!%p455_p1)
}
  0x23   :  { %22 = dma.hbm_to_vmem [thread:$0]  %s607_s0, 32, %s20_s8, [#allocation3]  }
  0x24   :  { %s459_s22 = scalar_lea.hbm %s610_s3, 1024 }
  0x25   :  { %p460_p2 = scmp.ne.s32.totalorder %s610_s3, %s459_s22  ;;  %p463_p3 = scmp.lt.u32.totalorder %s459_s22, %s610_s3 }
  0x27   :  { %p465_p4 = pnand %p463_p3, %p460_p2 }
  0x29   :  { %468 = shalt.err (!%p465_p4)
}
  0x2a   :  { %s469_s27 = scalar_lea.vmem %s43_s10, 1024  ;;  %p474_p6 = scmp.lt.s32.totalorder %s43_s10, %s43_s10 }
  0x2b   :  { %p470_p5 = scmp.ne.s32.totalorder %s43_s10, %s469_s27  ;;  %p475_p7 = scmp.lt.s32.totalorder %s469_s27, %s469_s27 }
  0x2d   :  { %p476_p8 = por %p475_p7, %p474_p6 }
  0x2f   :  { %p477_p9 = pnand %p476_p8, %p470_p5 }
  0x31   :  { %480 = shalt.err (!%p477_p9)
}
  0x32   :  { %48 = dma.hbm_to_vmem [thread:$0]  %s610_s3, 1024, %s43_s10, [#allocation6], %s510_s28, %s510_s28, %s511_s29  }
  0x33   :  { %503 = dma.done.wait [#allocation3], 32  }
  0x34   :  { %504 = vsyncadd [#allocation3], 4294967264 }
  0x35   :  { %505 = dma.done.wait [#allocation6], 2048  }
  0x36   :  { %506 = vsyncadd [#allocation6], 4294965248  ;;  %v514_v0 = vmov 0.0   ;;  %vm515_vm0 = vmmov 0   ;;  %v395_v1 = vld [vmem:[#allocation5] sm:$0xff]   ;;  %v396_v2 = vld [vmem:[#allocation5 + $0x8] sm:$0xff]  }
  0x37   :  { %347 = vmatprep.subr.bf16.mxu0 %v514_v0  ;;  %363 = vmatprep.mubr.msk.bf16.mxu0 %vm515_vm0, %v514_v0  ;;  %v397_v3 = vld [vmem:[#allocation5 + $0x10] sm:$0xff]   ;;  %v398_v4 = vld [vmem:[#allocation5 + $0x18] sm:$0xff]   ;;  %v399_v5 = vld [vmem:[#allocation5 + $0x20] sm:$0xff]   ;;  %s516_s7 = smov [#allocation8]  }
  0x38   :  { %367 = vmatprep.subr.bf16.mxu1 %v514_v0  ;;  %383 = vmatprep.mubr.msk.bf16.mxu1 %vm515_vm0, %v514_v0  ;;  %v400_v6 = vld [vmem:[#allocation5 + $0x28] sm:$0xff]   ;;  %v401_v7 = vld [vmem:[#allocation5 + $0x30] sm:$0xff]   ;;  %v402_v8 = vld [vmem:[#allocation5 + $0x38] sm:$0xff]  }
  0x39   :  { %348 = vmatpush3.bf16.msra.mxu0 %v395_v1  ;;  %v61_v9 = vld [vmem:[#allocation2] sm:$0x3]  ;;  %v403_v11 = vld [vmem:[#allocation7] sm:$0xff]   ;;  %v404_v12 = vld [vmem:[#allocation7 + $0x8] sm:$0xff]  }
  0x3a   :  { %349 = vmatprep.subr.bf16.mxu0 %v514_v0  ;;  %v62_v10 = vpack.c.bf16 %v61_v9, %v61_v9  ;;  %368 = vmatpush3.bf16.msra.mxu1 %v403_v11  ;;  %v405_v13 = vld [vmem:[#allocation7 + $0x10] sm:$0xff]   ;;  %v406_v14 = vld [vmem:[#allocation7 + $0x18] sm:$0xff]   ;;  %v407_v15 = vld [vmem:[#allocation7 + $0x20] sm:$0xff]  }
  0x3b   :  { %369 = vmatprep.subr.bf16.mxu1 %v514_v0  ;;  %v408_v16 = vld [vmem:[#allocation7 + $0x28] sm:$0xff]   ;;  %v409_v17 = vld [vmem:[#allocation7 + $0x30] sm:$0xff]   ;;  %v410_v18 = vld [vmem:[#allocation7 + $0x38] sm:$0xff]  }
  0x3c   :  { %v310_v19 = vld [vmem:[%s609_s2] ss:$0 sm:$0xff]  ;;  %s300_s2 = sshll.u32 %s516_s7, 4  ;;  %s301_s2 = int_to_ptr.vmem [resolvable:$true] %s300_s2 }
  0x3d   :  { %350 = vmatpush3.bf16.msra.mxu0 %v396_v2  ;;  %v320_v31 = vld [vmem:[%s611_s4] ss:$0 sm:$0xff]  ;;  %s481_s8 = scalar_lea.vmem %s301_s2, 32  ;;  %p486_p11 = scmp.lt.s32.totalorder %s301_s2, %s301_s2 }
  0x3e   :  { %351 = vmatprep.subr.bf16.mxu0 %v514_v0  ;;  %370 = vmatpush3.bf16.msra.mxu1 %v404_v12  ;;  %p482_p10 = scmp.ne.s32.totalorder %s301_s2, %s481_s8  ;;  %p487_p12 = scmp.lt.s32.totalorder %s481_s8, %s481_s8 }
  0x3f   :  { %371 = vmatprep.subr.bf16.mxu1 %v514_v0 }
  0x40   :  { %p488_p13 = por %p487_p12, %p486_p11 }
  0x41   :  { %352 = vmatpush3.bf16.msra.mxu0 %v397_v3 }
  0x42   :  { %353 = vmatprep.subr.bf16.mxu0 %v514_v0  ;;  %372 = vmatpush3.bf16.msra.mxu1 %v405_v13  ;;  %p489_p0 = pnand %p488_p13, %p482_p10 }
  0x43   :  { %373 = vmatprep.subr.bf16.mxu1 %v514_v0 }
  0x45   :  { %354 = vmatpush3.bf16.msra.mxu0 %v398_v4 }
  0x46   :  { %355 = vmatprep.subr.bf16.mxu0 %v514_v0  ;;  %374 = vmatpush3.bf16.msra.mxu1 %v406_v14 }
  0x47   :  { %375 = vmatprep.subr.bf16.mxu1 %v514_v0 }
  0x49   :  { %356 = vmatpush3.bf16.msra.mxu0 %v399_v5 }
  0x4a   :  { %357 = vmatprep.subr.bf16.mxu0 %v514_v0  ;;  %376 = vmatpush3.bf16.msra.mxu1 %v407_v15 }
  0x4b   :  { %377 = vmatprep.subr.bf16.mxu1 %v514_v0 }
  0x4d   :  { %358 = vmatpush3.bf16.msra.mxu0 %v400_v6 }
  0x4e   :  { %359 = vmatprep.subr.bf16.mxu0 %v514_v0  ;;  %378 = vmatpush3.bf16.msra.mxu1 %v408_v16 }
  0x4f   :  { %379 = vmatprep.subr.bf16.mxu1 %v514_v0 }
  0x51   :  { %360 = vmatpush3.bf16.msra.mxu0 %v401_v7 }
  0x52   :  { %361 = vmatprep.subr.bf16.mxu0 %v514_v0  ;;  %380 = vmatpush3.bf16.msra.mxu1 %v409_v17 }
  0x53   :  { %381 = vmatprep.subr.bf16.mxu1 %v514_v0 }
  0x55   :  { %362 = vmatpush3.bf16.msra.mxu0 %v402_v8 }
  0x56   :  { %382 = vmatpush3.bf16.msra.mxu1 %v410_v18 }
  0x58   :  { %364 = vmatmul.mubr.bf16.vlgmr.msra.gmra.mrb[0].mxu0 %v62_v10 }
 0x12b   :  { %v168_v20 = vpop.f32.mrb[0].mxu0 }
 0x12c   :  { %v169_v21 = vadd.f32 %v310_v19, %v168_v20  ;;  %v365_v22 = vpop.f32.mrb[1].mxu0 }
 0x12d   :  { %v171_v23 = vpop.f32.mrb[2].mxu0 }
 0x12e   :  { %v319_v24 = vmul.f32 -1.442695, %v169_v21  ;;  %v366_v25 = vpop.f32.mrb[3].mxu0 }
 0x130   :  { %411 = vpow2.f32 %v319_v24 }
 0x13a   :  { %v412_v26 = vpop.eup %411 }
 0x13b   :  { %v177_v27 = vadd.f32 1.0, %v412_v26 }
 0x13d   :  { %413 = vrcp.f32 %v177_v27 }
 0x147   :  { %v414_v28 = vpop.eup %413 }
 0x148   :  { %v180_v29 = vmul.f32 %v414_v28, %v169_v21 }
 0x14a   :  { %v181_v30 = vpack.c.bf16 %v180_v29, %v180_v29 }
 0x14c   :  { %384 = vmatmul.mubr.bf16.vlgmr.msra.gmra.mrb[0].mxu1 %v181_v30 }
 0x21f   :  { %v287_v32 = vpop.f32.mrb[0].mxu1 }
 0x220   :  { %v288_v33 = vadd.f32 %v320_v31, %v287_v32  ;;  %v385_v34 = vpop.f32.mrb[1].mxu1 }
 0x221   :  { %v290_v35 = vpop.f32.mrb[2].mxu1 }
 0x222   :  { %293 = vst [vmem:[#allocation8] sm:$0x3] %v288_v33  ;;  %v386_v36 = vpop.f32.mrb[3].mxu1 }
 0x223   :  { %492 = shalt.err (!%p489_p0)
}
 0x224   :  { %s493_s4 = scalar_lea.hbm %s612_s5, 32 }
 0x225   :  { %p494_p1 = scmp.ne.s32.totalorder %s612_s5, %s493_s4  ;;  %p497_p2 = scmp.lt.u32.totalorder %s493_s4, %s612_s5 }
 0x227   :  { %p499_p3 = pnand %p497_p2, %p494_p1 }
 0x229   :  { %502 = shalt.err (!%p499_p3)
}
 0x22a   :  { %303 = dma.vmem_to_hbm [thread:$0]  %s301_s2, 32, %s612_s5, [#allocation4]  }
 0x22b   :  { %507 = dma.done.wait [#allocation4], 32  }
 0x22c   :  { %508 = vsyncadd [#allocation4], 4294967264 }
 0x22d   :  { %307 = vsyncpa [#allocation3], 1 }
 0x22e   :  { %308 = vsyncpa [#allocation6], 1 }
 0x22f   :  { %309 = vsyncpa [#allocation4], 1 }

</bundles_post_ra>
